<compile_context>
chip_gen: v7x
topology: tpu7x:2x2x1
jax: 0.10.0
libtpu: 0.0.40
codegen_flags: <defaults>
</compile_context>

<pallas_src>
import math
from functools import partial

import jax
import jax.numpy as jnp
from jax import lax
from jax.experimental import pallas as pl
from jax.experimental.pallas import tpu as pltpu

EPS = 1e-5  # torch.nn.LayerNorm default eps


def _round_up(x, m):
    return (x + m - 1) // m * m


def _layernorm(x, gamma, beta):
    # one-pass stats (sum and sum-of-squares) -> fewer cross-lane reductions
    n = x.shape[-1]
    inv_n = 1.0 / n
    s1 = jnp.sum(x, axis=-1, keepdims=True)
    s2 = jnp.sum(x * x, axis=-1, keepdims=True)
    mean = s1 * inv_n
    var = s2 * inv_n - mean * mean          # biased variance, like torch
    return (x - mean) * lax.rsqrt(var + EPS) * gamma + beta


# ----------------------------------------------------------------------------
# Kernel: one full Transformer encoder block (MHA + AddNorm + FFN + AddNorm)
# ----------------------------------------------------------------------------
def encoder_block_kernel(valid_ref,                       # scalar prefetch (SMEM)
                         xq_ref, xkv_ref,                 # (1,TQ,H) / (1,S,H) bf16
                         wq_ref, wk_ref, wv_ref, wo_ref,  # (H,H) bf16
                         g1_ref, b1_ref,                  # (1,H) f32
                         w1_ref, bias1_ref,               # (H,F) bf16 / (1,F) f32
                         w2_ref, bias2_ref,               # (F,H) bf16 / (1,H) f32
                         g2_ref, b2_ref,                  # (1,H) f32
                         out_ref,                         # (1,TQ,H) bf16
                         k_sc, v_sc,                      # VMEM (S,H) bf16 scratch
                         concat_ref,                      # VMEM (TQ,H) f32 scratch
                         *, num_heads, ffn_chunk):
    b = pl.program_id(0)
    qt = pl.program_id(1)

    xq = xq_ref[0]                   # (TQ, H) bf16 -- query rows of this tile
    TQ, H = xq.shape
    S = xkv_ref.shape[1]
    d = H // num_heads
    scale = 1.0 / math.sqrt(d)

    # --- K / V projections: shared by all query tiles of this batch row, so
    #     compute them once (qt == 0) and keep them resident in VMEM scratch ---
    @pl.when(qt == 0)
    def _():
        xkv = xkv_ref[0]             # (S, H) bf16 -- full sequence (keys/values)
        k_sc[...] = jnp.dot(xkv, wk_ref[...],
                            preferred_element_type=jnp.float32).astype(jnp.bfloat16)
        v_sc[...] = jnp.dot(xkv, wv_ref[...],
                            preferred_element_type=jnp.float32).astype(jnp.bfloat16)

    # --- Q projection (per tile): bf16 operands on the MXU, f32 accumulation --
    q = jnp.dot(xq, wq_ref[...], preferred_element_type=jnp.float32)
    q16 = (q * scale).astype(jnp.bfloat16)     # fold 1/sqrt(d) into Q
    k16 = k_sc[...]
    v16 = v_sc[...]

    # --- additive mask bias, computed once (torch masks scores with -1e6) ----
    valid = valid_ref[b]
    col = lax.broadcasted_iota(jnp.int32, (1, S), 1)
    mask_bias = jnp.where(col < valid, 0.0, -1e6).astype(jnp.float32)   # (1, S)

    # --- per-head attention; heads written into column slices of a (TQ,H)
    #     scratch so the output projection is ONE K=H matmul against W_o ------
    for h in range(num_heads):
        qh = q16[:, h * d:(h + 1) * d]
        kh = k16[:, h * d:(h + 1) * d]
        vh = v16[:, h * d:(h + 1) * d]
        s = lax.dot_general(qh, kh, (((1,), (1,)), ((), ())),
                            preferred_element_type=jnp.float32)         # (TQ, S)
        s = s + mask_bias
        s = s - jnp.max(s, axis=-1, keepdims=True)
        p = jnp.exp(s)
        p = p * pl.reciprocal(jnp.sum(p, axis=-1, keepdims=True), approx=True)
        concat_ref[:, h * d:(h + 1) * d] = jnp.dot(
            p.astype(jnp.bfloat16), vh, preferred_element_type=jnp.float32)

    attn = jnp.dot(concat_ref[...].astype(jnp.bfloat16), wo_ref[...],
                   preferred_element_type=jnp.float32)                  # (TQ, H)

    # --- AddNorm 1 (f32 elementwise path) -------------------------------------
    y = _layernorm(xq.astype(jnp.float32) + attn, g1_ref[...], b1_ref[...])

    # --- position-wise FFN, chunked over the hidden (F) axis ------------------
    y16 = y.astype(jnp.bfloat16)
    F = w1_ref.shape[1]
    z = jnp.zeros_like(y)
    for c in range(0, F, ffn_chunk):
        hdn = jnp.dot(y16, w1_ref[:, c:c + ffn_chunk],
                      preferred_element_type=jnp.float32)
        hdn = jnp.maximum(hdn + bias1_ref[:, c:c + ffn_chunk], 0.0)
        z = z + jnp.dot(hdn.astype(jnp.bfloat16), w2_ref[c:c + ffn_chunk, :],
                        preferred_element_type=jnp.float32)
    z = z + bias2_ref[...]

    # --- AddNorm 2 -------------------------------------------------------------
    out_ref[0] = _layernorm(y + z, g2_ref[...], b2_ref[...]).astype(out_ref.dtype)


def encoder_block(x, valid_lens, p, num_heads, *, tq):
    """x: (B, S_pad, H) bf16; returns (B, S_pad, H) bf16."""
    B, S, H = x.shape                       # S already padded to a multiple of tq
    F = p["w1"].shape[1]
    ffn_chunk = 512 if (F > 512 and F % 512 == 0) else F
    kern = partial(encoder_block_kernel, num_heads=num_heads, ffn_chunk=ffn_chunk)

    def full(shp):
        return pl.BlockSpec(shp, lambda b, qt, vl, _n=len(shp): (0,) * _n)

    # TODO(synk): weights are still double-buffered by the default pipeline even
    # though their block index never changes; a 1-deep pipeline_mode would halve
    # their VMEM footprint on v7x (64 MiB VMEM).
    return pl.pallas_call(
        kern,
        out_shape=jax.ShapeDtypeStruct((B, S, H), jnp.bfloat16),
        grid_spec=pltpu.PrefetchScalarGridSpec(
            num_scalar_prefetch=1,
            grid=(B, S // tq),
            in_specs=[
                pl.BlockSpec((1, tq, H), lambda b, qt, vl: (b, qt, 0)),  # query tile
                pl.BlockSpec((1, S, H), lambda b, qt, vl: (b, 0, 0)),    # full seq (K/V)
                full((H, H)), full((H, H)), full((H, H)), full((H, H)),
                full((1, H)), full((1, H)),
                full((H, F)), full((1, F)), full((F, H)), full((1, H)),
                full((1, H)), full((1, H)),
            ],
            out_specs=pl.BlockSpec((1, tq, H), lambda b, qt, vl: (b, qt, 0)),
            scratch_shapes=[
                pltpu.VMEM((S, H), jnp.bfloat16),    # cached K (per batch row)
                pltpu.VMEM((S, H), jnp.bfloat16),    # cached V (per batch row)
                pltpu.VMEM((tq, H), jnp.float32),    # per-head concat buffer
            ],
        ),
        compiler_params=pltpu.CompilerParams(
            # batch axis parallel (megacore), query-tile axis arbitrary so the
            # qt==0 K/V cache is computed before the remaining tiles of a row.
            dimension_semantics=("parallel", "arbitrary"),
            vmem_limit_bytes=48 * 1024 * 1024),      # headroom for v7x's 64 MiB
    )(valid_lens, x, x,
      p["wq"], p["wk"], p["wv"], p["wo"],
      p["g1"], p["b1"],
      p["w1"], p["bias1"], p["w2"], p["bias2"],
      p["g2"], p["b2"])


# ----------------------------------------------------------------------------
# Model wrapper
# ----------------------------------------------------------------------------
def make_params(key, vocab_size, num_hiddens, ffn_hiddens, num_layers):
    keys = jax.random.split(key, 1 + num_layers)
    emb_table = 0.02 * jax.random.normal(keys[0], (vocab_size, num_hiddens),
                                         dtype=jnp.float32)
    layers = []
    for i in range(num_layers):
        ks = jax.random.split(keys[1 + i], 8)
        H, F = num_hiddens, ffn_hiddens
        layers.append(dict(
            # matmul weights stored bf16 (MXU operands); LN/bias params stay f32
            wq=(0.05 * jax.random.normal(ks[0], (H, H), jnp.float32)).astype(jnp.bfloat16),
            wk=(0.05 * jax.random.normal(ks[1], (H, H), jnp.float32)).astype(jnp.bfloat16),
            wv=(0.05 * jax.random.normal(ks[2], (H, H), jnp.float32)).astype(jnp.bfloat16),
            wo=(0.05 * jax.random.normal(ks[3], (H, H), jnp.float32)).astype(jnp.bfloat16),
            g1=jnp.ones((1, H), jnp.float32),
            b1=jnp.zeros((1, H), jnp.float32),
            w1=(0.05 * jax.random.normal(ks[4], (H, F), jnp.float32)).astype(jnp.bfloat16),
            bias1=0.01 * jax.random.normal(ks[5], (1, F), jnp.float32),
            w2=(0.05 * jax.random.normal(ks[6], (F, H), jnp.float32)).astype(jnp.bfloat16),
            bias2=0.01 * jax.random.normal(ks[7], (1, H), jnp.float32),
            g2=jnp.ones((1, H), jnp.float32),
            b2=jnp.zeros((1, H), jnp.float32),
        ))
    return emb_table, layers


def positional_table(seq_len, num_hiddens):
    pos = jnp.arange(seq_len, dtype=jnp.float32)[:, None]
    div = jnp.power(10000.0,
                    jnp.arange(0, num_hiddens, 2, dtype=jnp.float32) / num_hiddens)
    ang = pos / div                                   # (S, H/2)
    P = jnp.zeros((1, seq_len, num_hiddens), jnp.float32)
    P = P.at[0, :, 0::2].set(jnp.sin(ang))
    P = P.at[0, :, 1::2].set(jnp.cos(ang))
    return P


def transformer_encoder(tokens, valid_lens, emb_table, layer_params,
                        num_hiddens, num_heads):
    B, S = tokens.shape
    H = num_hiddens

    # TODO(synk): embedding gather is data-dependent; left in plain JAX so XLA
    # fuses it with the sqrt(H) scale + positional add (no standalone Pallas
    # elementwise kernel / extra HBM round trip before layer 0).
    emb = jnp.take(emb_table, tokens, axis=0)                 # (B, S, H) f32
    pos = positional_table(S, H)                              # (1, S, H) f32
    x = (emb * math.sqrt(H) + pos).astype(jnp.bfloat16)       # bf16 inter-layer acts

    # query-tile size + sequence padding so the grid divides evenly.
    # TODO(synk): H is not padded to a 128-lane multiple (would change LayerNorm
    # semantics); lane-dense H should come from the model config.
    if S <= 256:
        tq = _round_up(S, 8)
    else:
        tq = 256
    S_pad = _round_up(S, tq)
    if S_pad != S:
        x = jnp.pad(x, ((0, 0), (0, S_pad - S), (0, 0)))      # padded keys are masked

    if valid_lens is None:
        valid_lens = jnp.full((B,), S, dtype=jnp.int32)
    valid_lens = valid_lens.astype(jnp.int32)

    for p in layer_params:
        x = encoder_block(x, valid_lens, p, num_heads, tq=tq)  # Pallas block kernel

    return x[:, :S, :].astype(jnp.float32)


if __name__ == "__main__":
    VOCAB, H, HEADS, FFN, LAYERS = 100, 32, 4, 64, 2
    B, S = 2, 8

    key = jax.random.PRNGKey(0)
    k_tok, k_par = jax.random.split(key)
    tokens = jax.random.randint(k_tok, (B, S), 0, VOCAB, dtype=jnp.int32)
    valid_lens = jnp.array([5, 8], dtype=jnp.int32)

    emb_table, layer_params = make_params(k_par, VOCAB, H, FFN, LAYERS)

    fwd = jax.jit(partial(transformer_encoder, num_hiddens=H, num_heads=HEADS))
    out = fwd(tokens, valid_lens, emb_table, layer_params)
    out = jax.block_until_ready(out)
    assert out.shape == (B, S, H)
    assert bool(jnp.all(jnp.isfinite(out)))
    print("KERNEL_OK")
</pallas_src>

<mosaic_0001>
module attributes {stable_mosaic.version = 11 : i64} {
  func.func @encoder_block_kernel(%arg0: i32, %arg1: i32, %arg2: memref<2xi32, #tpu.memory_space<smem>>, %arg3: memref<1x8x32xbf16, #tpu.memory_space<vmem>>, %arg4: memref<1x8x32xbf16, #tpu.memory_space<vmem>>, %arg5: memref<32x32xbf16, #tpu.memory_space<vmem>>, %arg6: memref<32x32xbf16, #tpu.memory_space<vmem>>, %arg7: memref<32x32xbf16, #tpu.memory_space<vmem>>, %arg8: memref<32x32xbf16, #tpu.memory_space<vmem>>, %arg9: memref<1x32xf32, #tpu.memory_space<vmem>>, %arg10: memref<1x32xf32, #tpu.memory_space<vmem>>, %arg11: memref<32x64xbf16, #tpu.memory_space<vmem>>, %arg12: memref<1x64xf32, #tpu.memory_space<vmem>>, %arg13: memref<64x32xbf16, #tpu.memory_space<vmem>>, %arg14: memref<1x32xf32, #tpu.memory_space<vmem>>, %arg15: memref<1x32xf32, #tpu.memory_space<vmem>>, %arg16: memref<1x32xf32, #tpu.memory_space<vmem>>, %arg17: memref<1x8x32xbf16, #tpu.memory_space<vmem>>, %arg18: memref<8x32xbf16, #tpu.memory_space<vmem>>, %arg19: memref<8x32xbf16, #tpu.memory_space<vmem>>, %arg20: memref<8x32xf32, #tpu.memory_space<vmem>>) attributes {dimension_semantics = [#tpu.dimension_semantics<parallel>, #tpu.dimension_semantics<arbitrary>], iteration_bounds = array<i64: 2, 1>, scalar_prefetch = 1 : i64, scratch_operands = 3 : i64, tpu.core_type = #tpu.core_type<tc>, window_params = [{transform_indices = @transform_0, window_bounds = array<i64: 1, 8, 32>}, {transform_indices = @transform_1, window_bounds = array<i64: 1, 8, 32>}, {pipeline_mode = #tpu.pipeline_mode<synchronous>, transform_indices = @transform_2, window_bounds = array<i64: 32, 32>}, {pipeline_mode = #tpu.pipeline_mode<synchronous>, transform_indices = @transform_3, window_bounds = array<i64: 32, 32>}, {pipeline_mode = #tpu.pipeline_mode<synchronous>, transform_indices = @transform_4, window_bounds = array<i64: 32, 32>}, {pipeline_mode = #tpu.pipeline_mode<synchronous>, transform_indices = @transform_5, window_bounds = array<i64: 32, 32>}, {pipeline_mode = #tpu.pipeline_mode<synchronous>, transform_indices = @transform_6, window_bounds = array<i64: 1, 32>}, {pipeline_mode = #tpu.pipeline_mode<synchronous>, transform_indices = @transform_7, window_bounds = array<i64: 1, 32>}, {pipeline_mode = #tpu.pipeline_mode<synchronous>, transform_indices = @transform_8, window_bounds = array<i64: 32, 64>}, {pipeline_mode = #tpu.pipeline_mode<synchronous>, transform_indices = @transform_9, window_bounds = array<i64: 1, 64>}, {pipeline_mode = #tpu.pipeline_mode<synchronous>, transform_indices = @transform_10, window_bounds = array<i64: 64, 32>}, {pipeline_mode = #tpu.pipeline_mode<synchronous>, transform_indices = @transform_11, window_bounds = array<i64: 1, 32>}, {pipeline_mode = #tpu.pipeline_mode<synchronous>, transform_indices = @transform_12, window_bounds = array<i64: 1, 32>}, {pipeline_mode = #tpu.pipeline_mode<synchronous>, transform_indices = @transform_13, window_bounds = array<i64: 1, 32>}, {transform_indices = @transform_14, window_bounds = array<i64: 1, 8, 32>}]} {
    %c0 = arith.constant 0 : index
    %c0_0 = arith.constant 0 : index
    %c0_1 = arith.constant 0 : index
    %0 = vector.load %arg3[%c0, %c0_0, %c0_1] : memref<1x8x32xbf16, #tpu.memory_space<vmem>>, vector<1x8x32xbf16>
    %1 = vector.shape_cast %0 : vector<1x8x32xbf16> to vector<8x32xbf16>
    %c0_i32 = arith.constant 0 : i32
    %2 = arith.cmpi eq, %arg1, %c0_i32 : i32
    %3 = arith.extui %2 : i1 to i32
    %c0_i32_2 = arith.constant 0 : i32
    %4 = arith.cmpi ne, %3, %c0_i32_2 : i32
    scf.if %4 {
      %c0_71 = arith.constant 0 : index
      %c0_72 = arith.constant 0 : index
      %c0_73 = arith.constant 0 : index
      %171 = vector.load %arg4[%c0_71, %c0_72, %c0_73] : memref<1x8x32xbf16, #tpu.memory_space<vmem>>, vector<1x8x32xbf16>
      %172 = vector.shape_cast %171 : vector<1x8x32xbf16> to vector<8x32xbf16>
      %c0_74 = arith.constant 0 : index
      %c0_75 = arith.constant 0 : index
      %173 = vector.load %arg6[%c0_74, %c0_75] : memref<32x32xbf16, #tpu.memory_space<vmem>>, vector<32x32xbf16>
      %cst_76 = arith.constant dense<0.000000e+00> : vector<8x32xf32>
      %174 = tpu.matmul %172, %173, %cst_76 {dimension_numbers = #tpu.dot_dimension_numbers<[1], [0], [0], [1], [0, 0, 1, 1], [], []>} : vector<8x32xbf16>, vector<32x32xbf16>, vector<8x32xf32> -> vector<8x32xf32>
      %175 = arith.truncf %174 : vector<8x32xf32> to vector<8x32xbf16>
      %c0_77 = arith.constant 0 : index
      %c0_78 = arith.constant 0 : index
      %176 = vector.load %arg18[%c0_77, %c0_78] : memref<8x32xbf16, #tpu.memory_space<vmem>>, vector<8x32xbf16>
      tpu.vector_store %arg18[%c0_77, %c0_78], %175 {strides = array<i32>} : memref<8x32xbf16, #tpu.memory_space<vmem>>, vector<8x32xbf16>,
      %c0_79 = arith.constant 0 : index
      %c0_80 = arith.constant 0 : index
      %177 = vector.load %arg7[%c0_79, %c0_80] : memref<32x32xbf16, #tpu.memory_space<vmem>>, vector<32x32xbf16>
      %cst_81 = arith.constant dense<0.000000e+00> : vector<8x32xf32>
      %178 = tpu.matmul %172, %177, %cst_81 {dimension_numbers = #tpu.dot_dimension_numbers<[1], [0], [0], [1], [0, 0, 1, 1], [], []>} : vector<8x32xbf16>, vector<32x32xbf16>, vector<8x32xf32> -> vector<8x32xf32>
      %179 = arith.truncf %178 : vector<8x32xf32> to vector<8x32xbf16>
      %c0_82 = arith.constant 0 : index
      %c0_83 = arith.constant 0 : index
      %180 = vector.load %arg19[%c0_82, %c0_83] : memref<8x32xbf16, #tpu.memory_space<vmem>>, vector<8x32xbf16>
      tpu.vector_store %arg19[%c0_82, %c0_83], %179 {strides = array<i32>} : memref<8x32xbf16, #tpu.memory_space<vmem>>, vector<8x32xbf16>,
    } else {
    }
    %c0_3 = arith.constant 0 : index
    %c0_4 = arith.constant 0 : index
    %5 = vector.load %arg5[%c0_3, %c0_4] : memref<32x32xbf16, #tpu.memory_space<vmem>>, vector<32x32xbf16>
    %cst = arith.constant dense<0.000000e+00> : vector<8x32xf32>
    %6 = tpu.matmul %1, %5, %cst {dimension_numbers = #tpu.dot_dimension_numbers<[1], [0], [0], [1], [0, 0, 1, 1], [], []>} : vector<8x32xbf16>, vector<32x32xbf16>, vector<8x32xf32> -> vector<8x32xf32>
    %cst_5 = arith.constant 0.353553385 : f32
    %7 = vector.broadcast %cst_5 : f32 to vector<8x32xf32>
    %8 = arith.mulf %6, %7 : vector<8x32xf32>
    %9 = arith.truncf %8 : vector<8x32xf32> to vector<8x32xbf16>
    %c0_6 = arith.constant 0 : index
    %c0_7 = arith.constant 0 : index
    %10 = vector.load %arg18[%c0_6, %c0_7] : memref<8x32xbf16, #tpu.memory_space<vmem>>, vector<8x32xbf16>
    %c0_8 = arith.constant 0 : index
    %c0_9 = arith.constant 0 : index
    %11 = vector.load %arg19[%c0_8, %c0_9] : memref<8x32xbf16, #tpu.memory_space<vmem>>, vector<8x32xbf16>
    %12 = arith.index_cast %arg0 : i32 to index
    %13 = memref.load %arg2[%12] : memref<2xi32, #tpu.memory_space<smem>>
    %14 = tpu.iota {dimensions = array<i32: 1>} : vector<1x8xi32>
    %15 = vector.broadcast %13 : i32 to vector<1x8xi32>
    %16 = arith.cmpi slt, %14, %15 : vector<1x8xi32>
    %cst_10 = arith.constant 0.000000e+00 : f32
    %cst_11 = arith.constant -1.000000e+06 : f32
    %17 = vector.broadcast %cst_10 : f32 to vector<1x8xf32>
    %18 = vector.broadcast %cst_11 : f32 to vector<1x8xf32>
    %19 = arith.select %16, %17, %18 : vector<1x8xi1>, vector<1x8xf32>
    %20 = vector.extract_strided_slice %9 {offsets = [0, 0], sizes = [8, 8], strides = [1, 1]} : vector<8x32xbf16> to vector<8x8xbf16>
    %21 = vector.extract_strided_slice %10 {offsets = [0, 0], sizes = [8, 8], strides = [1, 1]} : vector<8x32xbf16> to vector<8x8xbf16>
    %22 = vector.extract_strided_slice %11 {offsets = [0, 0], sizes = [8, 8], strides = [1, 1]} : vector<8x32xbf16> to vector<8x8xbf16>
    %cst_12 = arith.constant dense<0.000000e+00> : vector<8x8xf32>
    %23 = tpu.matmul %20, %21, %cst_12 {dimension_numbers = #tpu.dot_dimension_numbers<[1], [1], [0], [0], [0, 0, 1, 0], [], []>} : vector<8x8xbf16>, vector<8x8xbf16>, vector<8x8xf32> -> vector<8x8xf32>
    %24 = vector.broadcast %19 : vector<1x8xf32> to vector<8x8xf32>
    %25 = arith.addf %23, %24 : vector<8x8xf32>
    %cst_13 = arith.constant dense<0xFF800000> : vector<8xf32>
    %26 = vector.multi_reduction <maximumf>, %25, %cst_13 [1] : vector<8x8xf32> to vector<8xf32>
    %27 = vector.shape_cast %26 : vector<8xf32> to vector<8x1xf32>
    %28 = vector.broadcast %27 : vector<8x1xf32> to vector<8x8xf32>
    %29 = arith.subf %25, %28 : vector<8x8xf32>
    %30 = math.exp %29 : vector<8x8xf32>
    %cst_14 = arith.constant dense<0.000000e+00> : vector<8xf32>
    %31 = vector.multi_reduction <add>, %30, %cst_14 [1] : vector<8x8xf32> to vector<8xf32>
    %32 = vector.shape_cast %31 : vector<8xf32> to vector<8x1xf32>
    %33 = tpu.reciprocal %32 {approx = true} : vector<8x1xf32> -> vector<8x1xf32>
    %34 = vector.broadcast %33 : vector<8x1xf32> to vector<8x8xf32>
    %35 = arith.mulf %30, %34 : vector<8x8xf32>
    %36 = arith.truncf %35 : vector<8x8xf32> to vector<8x8xbf16>
    %cst_15 = arith.constant dense<0.000000e+00> : vector<8x8xf32>
    %37 = tpu.matmul %36, %22, %cst_15 {dimension_numbers = #tpu.dot_dimension_numbers<[1], [0], [0], [1], [0, 0, 1, 1], [], []>} : vector<8x8xbf16>, vector<8x8xbf16>, vector<8x8xf32> -> vector<8x8xf32>
    %c0_16 = arith.constant 0 : index
    %c0_17 = arith.constant 0 : index
    %38 = vector.load %arg20[%c0_16, %c0_17] : memref<8x32xf32, #tpu.memory_space<vmem>>, vector<8x8xf32>
    tpu.vector_store %arg20[%c0_16, %c0_17], %37 {strides = array<i32>} : memref<8x32xf32, #tpu.memory_space<vmem>>, vector<8x8xf32>,
    %39 = vector.extract_strided_slice %9 {offsets = [0, 8], sizes = [8, 8], strides = [1, 1]} : vector<8x32xbf16> to vector<8x8xbf16>
    %40 = vector.extract_strided_slice %10 {offsets = [0, 8], sizes = [8, 8], strides = [1, 1]} : vector<8x32xbf16> to vector<8x8xbf16>
    %41 = vector.extract_strided_slice %11 {offsets = [0, 8], sizes = [8, 8], strides = [1, 1]} : vector<8x32xbf16> to vector<8x8xbf16>
    %cst_18 = arith.constant dense<0.000000e+00> : vector<8x8xf32>
    %42 = tpu.matmul %39, %40, %cst_18 {dimension_numbers = #tpu.dot_dimension_numbers<[1], [1], [0], [0], [0, 0, 1, 0], [], []>} : vector<8x8xbf16>, vector<8x8xbf16>, vector<8x8xf32> -> vector<8x8xf32>
    %43 = vector.broadcast %19 : vector<1x8xf32> to vector<8x8xf32>
    %44 = arith.addf %42, %43 : vector<8x8xf32>
    %cst_19 = arith.constant dense<0xFF800000> : vector<8xf32>
    %45 = vector.multi_reduction <maximumf>, %44, %cst_19 [1] : vector<8x8xf32> to vector<8xf32>
    %46 = vector.shape_cast %45 : vector<8xf32> to vector<8x1xf32>
    %47 = vector.broadcast %46 : vector<8x1xf32> to vector<8x8xf32>
    %48 = arith.subf %44, %47 : vector<8x8xf32>
    %49 = math.exp %48 : vector<8x8xf32>
    %cst_20 = arith.constant dense<0.000000e+00> : vector<8xf32>
    %50 = vector.multi_reduction <add>, %49, %cst_20 [1] : vector<8x8xf32> to vector<8xf32>
    %51 = vector.shape_cast %50 : vector<8xf32> to vector<8x1xf32>
    %52 = tpu.reciprocal %51 {approx = true} : vector<8x1xf32> -> vector<8x1xf32>
    %53 = vector.broadcast %52 : vector<8x1xf32> to vector<8x8xf32>
    %54 = arith.mulf %49, %53 : vector<8x8xf32>
    %55 = arith.truncf %54 : vector<8x8xf32> to vector<8x8xbf16>
    %cst_21 = arith.constant dense<0.000000e+00> : vector<8x8xf32>
    %56 = tpu.matmul %55, %41, %cst_21 {dimension_numbers = #tpu.dot_dimension_numbers<[1], [0], [0], [1], [0, 0, 1, 1], [], []>} : vector<8x8xbf16>, vector<8x8xbf16>, vector<8x8xf32> -> vector<8x8xf32>
    %c0_22 = arith.constant 0 : index
    %c8 = arith.constant 8 : index
    %57 = vector.load %arg20[%c0_22, %c8] : memref<8x32xf32, #tpu.memory_space<vmem>>, vector<8x8xf32>
    tpu.vector_store %arg20[%c0_22, %c8], %56 {strides = array<i32>} : memref<8x32xf32, #tpu.memory_space<vmem>>, vector<8x8xf32>,
    %58 = vector.extract_strided_slice %9 {offsets = [0, 16], sizes = [8, 8], strides = [1, 1]} : vector<8x32xbf16> to vector<8x8xbf16>
    %59 = vector.extract_strided_slice %10 {offsets = [0, 16], sizes = [8, 8], strides = [1, 1]} : vector<8x32xbf16> to vector<8x8xbf16>
    %60 = vector.extract_strided_slice %11 {offsets = [0, 16], sizes = [8, 8], strides = [1, 1]} : vector<8x32xbf16> to vector<8x8xbf16>
    %cst_23 = arith.constant dense<0.000000e+00> : vector<8x8xf32>
    %61 = tpu.matmul %58, %59, %cst_23 {dimension_numbers = #tpu.dot_dimension_numbers<[1], [1], [0], [0], [0, 0, 1, 0], [], []>} : vector<8x8xbf16>, vector<8x8xbf16>, vector<8x8xf32> -> vector<8x8xf32>
    %62 = vector.broadcast %19 : vector<1x8xf32> to vector<8x8xf32>
    %63 = arith.addf %61, %62 : vector<8x8xf32>
    %cst_24 = arith.constant dense<0xFF800000> : vector<8xf32>
    %64 = vector.multi_reduction <maximumf>, %63, %cst_24 [1] : vector<8x8xf32> to vector<8xf32>
    %65 = vector.shape_cast %64 : vector<8xf32> to vector<8x1xf32>
    %66 = vector.broadcast %65 : vector<8x1xf32> to vector<8x8xf32>
    %67 = arith.subf %63, %66 : vector<8x8xf32>
    %68 = math.exp %67 : vector<8x8xf32>
    %cst_25 = arith.constant dense<0.000000e+00> : vector<8xf32>
    %69 = vector.multi_reduction <add>, %68, %cst_25 [1] : vector<8x8xf32> to vector<8xf32>
    %70 = vector.shape_cast %69 : vector<8xf32> to vector<8x1xf32>
    %71 = tpu.reciprocal %70 {approx = true} : vector<8x1xf32> -> vector<8x1xf32>
    %72 = vector.broadcast %71 : vector<8x1xf32> to vector<8x8xf32>
    %73 = arith.mulf %68, %72 : vector<8x8xf32>
    %74 = arith.truncf %73 : vector<8x8xf32> to vector<8x8xbf16>
    %cst_26 = arith.constant dense<0.000000e+00> : vector<8x8xf32>
    %75 = tpu.matmul %74, %60, %cst_26 {dimension_numbers = #tpu.dot_dimension_numbers<[1], [0], [0], [1], [0, 0, 1, 1], [], []>} : vector<8x8xbf16>, vector<8x8xbf16>, vector<8x8xf32> -> vector<8x8xf32>
    %c0_27 = arith.constant 0 : index
    %c16 = arith.constant 16 : index
    %76 = vector.load %arg20[%c0_27, %c16] : memref<8x32xf32, #tpu.memory_space<vmem>>, vector<8x8xf32>
    tpu.vector_store %arg20[%c0_27, %c16], %75 {strides = array<i32>} : memref<8x32xf32, #tpu.memory_space<vmem>>, vector<8x8xf32>,
    %77 = vector.extract_strided_slice %9 {offsets = [0, 24], sizes = [8, 8], strides = [1, 1]} : vector<8x32xbf16> to vector<8x8xbf16>
    %78 = vector.extract_strided_slice %10 {offsets = [0, 24], sizes = [8, 8], strides = [1, 1]} : vector<8x32xbf16> to vector<8x8xbf16>
    %79 = vector.extract_strided_slice %11 {offsets = [0, 24], sizes = [8, 8], strides = [1, 1]} : vector<8x32xbf16> to vector<8x8xbf16>
    %cst_28 = arith.constant dense<0.000000e+00> : vector<8x8xf32>
    %80 = tpu.matmul %77, %78, %cst_28 {dimension_numbers = #tpu.dot_dimension_numbers<[1], [1], [0], [0], [0, 0, 1, 0], [], []>} : vector<8x8xbf16>, vector<8x8xbf16>, vector<8x8xf32> -> vector<8x8xf32>
    %81 = vector.broadcast %19 : vector<1x8xf32> to vector<8x8xf32>
    %82 = arith.addf %80, %81 : vector<8x8xf32>
    %cst_29 = arith.constant dense<0xFF800000> : vector<8xf32>
    %83 = vector.multi_reduction <maximumf>, %82, %cst_29 [1] : vector<8x8xf32> to vector<8xf32>
    %84 = vector.shape_cast %83 : vector<8xf32> to vector<8x1xf32>
    %85 = vector.broadcast %84 : vector<8x1xf32> to vector<8x8xf32>
    %86 = arith.subf %82, %85 : vector<8x8xf32>
    %87 = math.exp %86 : vector<8x8xf32>
    %cst_30 = arith.constant dense<0.000000e+00> : vector<8xf32>
    %88 = vector.multi_reduction <add>, %87, %cst_30 [1] : vector<8x8xf32> to vector<8xf32>
    %89 = vector.shape_cast %88 : vector<8xf32> to vector<8x1xf32>
    %90 = tpu.reciprocal %89 {approx = true} : vector<8x1xf32> -> vector<8x1xf32>
    %91 = vector.broadcast %90 : vector<8x1xf32> to vector<8x8xf32>
    %92 = arith.mulf %87, %91 : vector<8x8xf32>
    %93 = arith.truncf %92 : vector<8x8xf32> to vector<8x8xbf16>
    %cst_31 = arith.constant dense<0.000000e+00> : vector<8x8xf32>
    %94 = tpu.matmul %93, %79, %cst_31 {dimension_numbers = #tpu.dot_dimension_numbers<[1], [0], [0], [1], [0, 0, 1, 1], [], []>} : vector<8x8xbf16>, vector<8x8xbf16>, vector<8x8xf32> -> vector<8x8xf32>
    %c0_32 = arith.constant 0 : index
    %c24 = arith.constant 24 : index
    %95 = vector.load %arg20[%c0_32, %c24] : memref<8x32xf32, #tpu.memory_space<vmem>>, vector<8x8xf32>
    tpu.vector_store %arg20[%c0_32, %c24], %94 {strides = array<i32>} : memref<8x32xf32, #tpu.memory_space<vmem>>, vector<8x8xf32>,
    %c0_33 = arith.constant 0 : index
    %c0_34 = arith.constant 0 : index
    %96 = vector.load %arg20[%c0_33, %c0_34] : memref<8x32xf32, #tpu.memory_space<vmem>>, vector<8x32xf32>
    %97 = arith.truncf %96 : vector<8x32xf32> to vector<8x32xbf16>
    %c0_35 = arith.constant 0 : index
    %c0_36 = arith.constant 0 : index
    %98 = vector.load %arg8[%c0_35, %c0_36] : memref<32x32xbf16, #tpu.memory_space<vmem>>, vector<32x32xbf16>
    %cst_37 = arith.constant dense<0.000000e+00> : vector<8x32xf32>
    %99 = tpu.matmul %97, %98, %cst_37 {dimension_numbers = #tpu.dot_dimension_numbers<[1], [0], [0], [1], [0, 0, 1, 1], [], []>} : vector<8x32xbf16>, vector<32x32xbf16>, vector<8x32xf32> -> vector<8x32xf32>
    %100 = arith.extf %1 : vector<8x32xbf16> to vector<8x32xf32>
    %101 = arith.addf %100, %99 : vector<8x32xf32>
    %c0_38 = arith.constant 0 : index
    %c0_39 = arith.constant 0 : index
    %102 = vector.load %arg9[%c0_38, %c0_39] : memref<1x32xf32, #tpu.memory_space<vmem>>, vector<1x32xf32>
    %c0_40 = arith.constant 0 : index
    %c0_41 = arith.constant 0 : index
    %103 = vector.load %arg10[%c0_40, %c0_41] : memref<1x32xf32, #tpu.memory_space<vmem>>, vector<1x32xf32>
    %cst_42 = arith.constant dense<0.000000e+00> : vector<8xf32>
    %104 = vector.multi_reduction <add>, %101, %cst_42 [1] : vector<8x32xf32> to vector<8xf32>
    %105 = vector.shape_cast %104 : vector<8xf32> to vector<8x1xf32>
    %106 = arith.mulf %101, %101 : vector<8x32xf32>
    %cst_43 = arith.constant dense<0.000000e+00> : vector<8xf32>
    %107 = vector.multi_reduction <add>, %106, %cst_43 [1] : vector<8x32xf32> to vector<8xf32>
    %108 = vector.shape_cast %107 : vector<8xf32> to vector<8x1xf32>
    %cst_44 = arith.constant 3.125000e-02 : f32
    %109 = vector.broadcast %cst_44 : f32 to vector<8x1xf32>
    %110 = arith.mulf %105, %109 : vector<8x1xf32>
    %cst_45 = arith.constant 3.125000e-02 : f32
    %111 = vector.broadcast %cst_45 : f32 to vector<8x1xf32>
    %112 = arith.mulf %108, %111 : vector<8x1xf32>
    %113 = arith.mulf %110, %110 : vector<8x1xf32>
    %114 = arith.subf %112, %113 : vector<8x1xf32>
    %115 = vector.broadcast %110 : vector<8x1xf32> to vector<8x32xf32>
    %116 = arith.subf %101, %115 : vector<8x32xf32>
    %cst_46 = arith.constant 9.99999974E-6 : f32
    %117 = vector.broadcast %cst_46 : f32 to vector<8x1xf32>
    %118 = arith.addf %114, %117 : vector<8x1xf32>
    %119 = math.rsqrt %118 : vector<8x1xf32>
    %120 = vector.broadcast %119 : vector<8x1xf32> to vector<8x32xf32>
    %121 = arith.mulf %116, %120 : vector<8x32xf32>
    %122 = vector.broadcast %102 : vector<1x32xf32> to vector<8x32xf32>
    %123 = arith.mulf %121, %122 : vector<8x32xf32>
    %124 = vector.broadcast %103 : vector<1x32xf32> to vector<8x32xf32>
    %125 = arith.addf %123, %124 : vector<8x32xf32>
    %126 = arith.truncf %125 : vector<8x32xf32> to vector<8x32xbf16>
    %cst_47 = arith.constant 0.000000e+00 : f32
    %127 = vector.broadcast %cst_47 : f32 to vector<8x32xf32>
    %c0_48 = arith.constant 0 : index
    %c0_49 = arith.constant 0 : index
    %128 = vector.load %arg11[%c0_48, %c0_49] : memref<32x64xbf16, #tpu.memory_space<vmem>>, vector<32x64xbf16>
    %cst_50 = arith.constant dense<0.000000e+00> : vector<8x64xf32>
    %129 = tpu.matmul %126, %128, %cst_50 {dimension_numbers = #tpu.dot_dimension_numbers<[1], [0], [0], [1], [0, 0, 1, 1], [], []>} : vector<8x32xbf16>, vector<32x64xbf16>, vector<8x64xf32> -> vector<8x64xf32>
    %c0_51 = arith.constant 0 : index
    %c0_52 = arith.constant 0 : index
    %130 = vector.load %arg12[%c0_51, %c0_52] : memref<1x64xf32, #tpu.memory_space<vmem>>, vector<1x64xf32>
    %131 = vector.broadcast %130 : vector<1x64xf32> to vector<8x64xf32>
    %132 = arith.addf %129, %131 : vector<8x64xf32>
    %cst_53 = arith.constant 0.000000e+00 : f32
    %133 = vector.broadcast %cst_53 : f32 to vector<8x64xf32>
    %134 = arith.maximumf %132, %133 : vector<8x64xf32>
    %135 = arith.truncf %134 : vector<8x64xf32> to vector<8x64xbf16>
    %c0_54 = arith.constant 0 : index
    %c0_55 = arith.constant 0 : index
    %136 = vector.load %arg13[%c0_54, %c0_55] : memref<64x32xbf16, #tpu.memory_space<vmem>>, vector<64x32xbf16>
    %cst_56 = arith.constant dense<0.000000e+00> : vector<8x32xf32>
    %137 = tpu.matmul %135, %136, %cst_56 {dimension_numbers = #tpu.dot_dimension_numbers<[1], [0], [0], [1], [0, 0, 1, 1], [], []>} : vector<8x64xbf16>, vector<64x32xbf16>, vector<8x32xf32> -> vector<8x32xf32>
    %138 = arith.addf %127, %137 : vector<8x32xf32>
    %c0_57 = arith.constant 0 : index
    %c0_58 = arith.constant 0 : index
    %139 = vector.load %arg14[%c0_57, %c0_58] : memref<1x32xf32, #tpu.memory_space<vmem>>, vector<1x32xf32>
    %140 = vector.broadcast %139 : vector<1x32xf32> to vector<8x32xf32>
    %141 = arith.addf %138, %140 : vector<8x32xf32>
    %142 = arith.addf %125, %141 : vector<8x32xf32>
    %c0_59 = arith.constant 0 : index
    %c0_60 = arith.constant 0 : index
    %143 = vector.load %arg15[%c0_59, %c0_60] : memref<1x32xf32, #tpu.memory_space<vmem>>, vector<1x32xf32>
    %c0_61 = arith.constant 0 : index
    %c0_62 = arith.constant 0 : index
    %144 = vector.load %arg16[%c0_61, %c0_62] : memref<1x32xf32, #tpu.memory_space<vmem>>, vector<1x32xf32>
    %cst_63 = arith.constant dense<0.000000e+00> : vector<8xf32>
    %145 = vector.multi_reduction <add>, %142, %cst_63 [1] : vector<8x32xf32> to vector<8xf32>
    %146 = vector.shape_cast %145 : vector<8xf32> to vector<8x1xf32>
    %147 = arith.mulf %142, %142 : vector<8x32xf32>
    %cst_64 = arith.constant dense<0.000000e+00> : vector<8xf32>
    %148 = vector.multi_reduction <add>, %147, %cst_64 [1] : vector<8x32xf32> to vector<8xf32>
    %149 = vector.shape_cast %148 : vector<8xf32> to vector<8x1xf32>
    %cst_65 = arith.constant 3.125000e-02 : f32
    %150 = vector.broadcast %cst_65 : f32 to vector<8x1xf32>
    %151 = arith.mulf %146, %150 : vector<8x1xf32>
    %cst_66 = arith.constant 3.125000e-02 : f32
    %152 = vector.broadcast %cst_66 : f32 to vector<8x1xf32>
    %153 = arith.mulf %149, %152 : vector<8x1xf32>
    %154 = arith.mulf %151, %151 : vector<8x1xf32>
    %155 = arith.subf %153, %154 : vector<8x1xf32>
    %156 = vector.broadcast %151 : vector<8x1xf32> to vector<8x32xf32>
    %157 = arith.subf %142, %156 : vector<8x32xf32>
    %cst_67 = arith.constant 9.99999974E-6 : f32
    %158 = vector.broadcast %cst_67 : f32 to vector<8x1xf32>
    %159 = arith.addf %155, %158 : vector<8x1xf32>
    %160 = math.rsqrt %159 : vector<8x1xf32>
    %161 = vector.broadcast %160 : vector<8x1xf32> to vector<8x32xf32>
    %162 = arith.mulf %157, %161 : vector<8x32xf32>
    %163 = vector.broadcast %143 : vector<1x32xf32> to vector<8x32xf32>
    %164 = arith.mulf %162, %163 : vector<8x32xf32>
    %165 = vector.broadcast %144 : vector<1x32xf32> to vector<8x32xf32>
    %166 = arith.addf %164, %165 : vector<8x32xf32>
    %167 = arith.truncf %166 : vector<8x32xf32> to vector<8x32xbf16>
    %c0_68 = arith.constant 0 : index
    %c0_69 = arith.constant 0 : index
    %c0_70 = arith.constant 0 : index
    %168 = vector.load %arg17[%c0_68, %c0_69, %c0_70] : memref<1x8x32xbf16, #tpu.memory_space<vmem>>, vector<1x8x32xbf16>
    %169 = vector.shape_cast %168 : vector<1x8x32xbf16> to vector<8x32xbf16>
    %170 = vector.shape_cast %167 : vector<8x32xbf16> to vector<1x8x32xbf16>
    tpu.vector_store %arg17[%c0_68, %c0_69, %c0_70], %170 {strides = array<i32>} : memref<1x8x32xbf16, #tpu.memory_space<vmem>>, vector<1x8x32xbf16>,
    return
  }
  func.func @transform_0(%arg0: i32, %arg1: i32, %arg2: memref<2xi32, #tpu.memory_space<smem>>) -> (i32, i32, i32) {
    %c0_i32 = arith.constant 0 : i32
    %c0_i32_0 = arith.constant 0 : i32
    return %arg0, %arg1, %c0_i32 : i32, i32, i32
  }
  func.func @transform_1(%arg0: i32, %arg1: i32, %arg2: memref<2xi32, #tpu.memory_space<smem>>) -> (i32, i32, i32) {
    %c0_i32 = arith.constant 0 : i32
    %c0_i32_0 = arith.constant 0 : i32
    %c0_i32_1 = arith.constant 0 : i32
    return %arg0, %c0_i32, %c0_i32_0 : i32, i32, i32
  }
  func.func @transform_2(%arg0: i32, %arg1: i32, %arg2: memref<2xi32, #tpu.memory_space<smem>>) -> (i32, i32) {
    %c0_i32 = arith.constant 0 : i32
    %c0_i32_0 = arith.constant 0 : i32
    %c0_i32_1 = arith.constant 0 : i32
    return %c0_i32, %c0_i32_0 : i32, i32
  }
  func.func @transform_3(%arg0: i32, %arg1: i32, %arg2: memref<2xi32, #tpu.memory_space<smem>>) -> (i32, i32) {
    %c0_i32 = arith.constant 0 : i32
    %c0_i32_0 = arith.constant 0 : i32
    %c0_i32_1 = arith.constant 0 : i32
    return %c0_i32, %c0_i32_0 : i32, i32
  }
  func.func @transform_4(%arg0: i32, %arg1: i32, %arg2: memref<2xi32, #tpu.memory_space<smem>>) -> (i32, i32) {
    %c0_i32 = arith.constant 0 : i32
    %c0_i32_0 = arith.constant 0 : i32
    %c0_i32_1 = arith.constant 0 : i32
    return %c0_i32, %c0_i32_0 : i32, i32
  }
  func.func @transform_5(%arg0: i32, %arg1: i32, %arg2: memref<2xi32, #tpu.memory_space<smem>>) -> (i32, i32) {
    %c0_i32 = arith.constant 0 : i32
    %c0_i32_0 = arith.constant 0 : i32
    %c0_i32_1 = arith.constant 0 : i32
    return %c0_i32, %c0_i32_0 : i32, i32
  }
  func.func @transform_6(%arg0: i32, %arg1: i32, %arg2: memref<2xi32, #tpu.memory_space<smem>>) -> (i32, i32) {
    %c0_i32 = arith.constant 0 : i32
    %c0_i32_0 = arith.constant 0 : i32
    %c0_i32_1 = arith.constant 0 : i32
    return %c0_i32, %c0_i32_0 : i32, i32
  }
  func.func @transform_7(%arg0: i32, %arg1: i32, %arg2: memref<2xi32, #tpu.memory_space<smem>>) -> (i32, i32) {
    %c0_i32 = arith.constant 0 : i32
    %c0_i32_0 = arith.constant 0 : i32
    %c0_i32_1 = arith.constant 0 : i32
    return %c0_i32, %c0_i32_0 : i32, i32
  }
  func.func @transform_8(%arg0: i32, %arg1: i32, %arg2: memref<2xi32, #tpu.memory_space<smem>>) -> (i32, i32) {
    %c0_i32 = arith.constant 0 : i32
    %c0_i32_0 = arith.constant 0 : i32
    %c0_i32_1 = arith.constant 0 : i32
    return %c0_i32, %c0_i32_0 : i32, i32
  }
  func.func @transform_9(%arg0: i32, %arg1: i32, %arg2: memref<2xi32, #tpu.memory_space<smem>>) -> (i32, i32) {
    %c0_i32 = arith.constant 0 : i32
    %c0_i32_0 = arith.constant 0 : i32
    %c0_i32_1 = arith.constant 0 : i32
    return %c0_i32, %c0_i32_0 : i32, i32
  }
  func.func @transform_10(%arg0: i32, %arg1: i32, %arg2: memref<2xi32, #tpu.memory_space<smem>>) -> (i32, i32) {
    %c0_i32 = arith.constant 0 : i32
    %c0_i32_0 = arith.constant 0 : i32
    %c0_i32_1 = arith.constant 0 : i32
    return %c0_i32, %c0_i32_0 : i32, i32
  }
  func.func @transform_11(%arg0: i32, %arg1: i32, %arg2: memref<2xi32, #tpu.memory_space<smem>>) -> (i32, i32) {
    %c0_i32 = arith.constant 0 : i32
    %c0_i32_0 = arith.constant 0 : i32
    %c0_i32_1 = arith.constant 0 : i32
    return %c0_i32, %c0_i32_0 : i32, i32
  }
  func.func @transform_12(%arg0: i32, %arg1: i32, %arg2: memref<2xi32, #tpu.memory_space<smem>>) -> (i32, i32) {
    %c0_i32 = arith.constant 0 : i32
    %c0_i32_0 = arith.constant 0 : i32
    %c0_i32_1 = arith.constant 0 : i32
    return %c0_i32, %c0_i32_0 : i32, i32
  }
  func.func @transform_13(%arg0: i32, %arg1: i32, %arg2: memref<2xi32, #tpu.memory_space<smem>>) -> (i32, i32) {
    %c0_i32 = arith.constant 0 : i32
    %c0_i32_0 = arith.constant 0 : i32
    %c0_i32_1 = arith.constant 0 : i32
    return %c0_i32, %c0_i32_0 : i32, i32
  }
  func.func @transform_14(%arg0: i32, %arg1: i32, %arg2: memref<2xi32, #tpu.memory_space<smem>>) -> (i32, i32, i32) {
    %c0_i32 = arith.constant 0 : i32
    %c0_i32_0 = arith.constant 0 : i32
    return %arg0, %arg1, %c0_i32 : i32, i32, i32
  }
}

</mosaic_0001>

<bundles_post_ra>
// kernel: transformer_encoder.2
= control target key start
LH: loop header
LB: loop body
LE: loop exit
PB: predicated region body
PF: predicated region fallthrough
CT: control target
= control target key end

     0   :  { %s2139_s0 = inlined_call_operand.vmem [shape: s32[2], index: 0, kind: input, shape index: {}]   ;;  %s2140_s1 = inlined_call_operand.vmem [shape: bf16[2,8,32], index: 1, kind: input, shape index: {}, may-alias: {1,2}]   ;;  %s2141_s2 = inlined_call_operand.vmem [shape: bf16[2,8,32], index: 2, kind: input, shape index: {}, may-alias: {1,2}]   ;;  %s2142_s3 = inlined_call_operand.vmem [shape: bf16[32,32], index: 3, kind: input, shape index: {}]   ;;  %s2143_s4 = inlined_call_operand.vmem [shape: bf16[32,32], index: 4, kind: input, shape index: {}]   ;;  %s2144_s5 = inlined_call_operand.vmem [shape: bf16[32,32], index: 5, kind: input, shape index: {}]   ;;  %s2145_s6 = inlined_call_operand.vmem [shape: bf16[32,32], index: 6, kind: input, shape index: {}]   ;;  %s2146_s7 = inlined_call_operand.vmem [shape: f32[1,32], index: 7, kind: input, shape index: {}]   ;;  %s2147_s8 = inlined_call_operand.vmem [shape: f32[1,32], index: 8, kind: input, shape index: {}]   ;;  %s2148_s9 = inlined_call_operand.vmem [shape: bf16[32,64], index: 9, kind: input, shape index: {}]   ;;  %s2149_s10 = inlined_call_operand.vmem [shape: f32[1,64], index: 10, kind: input, shape index: {}]   ;;  %s2150_s11 = inlined_call_operand.vmem [shape: bf16[64,32], index: 11, kind: input, shape index: {}]   ;;  %s2151_s12 = inlined_call_operand.vmem [shape: f32[1,32], index: 12, kind: input, shape index: {}]   ;;  %s2152_s13 = inlined_call_operand.vmem [shape: f32[1,32], index: 13, kind: input, shape index: {}]   ;;  %s2153_s14 = inlined_call_operand.vmem [shape: f32[1,32], index: 14, kind: input, shape index: {}]   ;;  %s2154_s15 = inlined_call_operand.vmem [shape: bf16[2,8,32], index: 15, kind: output, shape index: {}]  }
   0x1   :  { %s20_s20 = sshll.u32 %s2139_s0, 4  ;;  %s21_s20 = int_to_ptr.vmem [resolvable:$true] %s20_s20 }
   0x2   :  { %s1797_s21 = scalar_lea.vmem %s21_s20, 16  ;;  %p1802_p1 = scmp.lt.s32.totalorder %s21_s20, %s21_s20 }
   0x3   :  { %p1798_p0 = scmp.ne.s32.totalorder %s21_s20, %s1797_s21  ;;  %p1803_p2 = scmp.lt.s32.totalorder %s1797_s21, %s1797_s21 }
   0x5   :  { %p1804_p3 = por %p1803_p2, %p1802_p1 }
   0x7   :  { %p1805_p4 = pnand %p1804_p3, %p1798_p0 }
   0x9   :  { %1808 = shalt.err (!%p1805_p4)  }
   0xa   :  { %s1835_s22 = smov [#allocation6]  }
   0xb   :  { %23 = dma.vmem_to_smem %s21_s20, 16, %s1835_s22, [#allocation5] }
   0xc   :  { %1821 = dma.done.wait [#allocation5], 16 }
   0xd   :  { %1822 = vsyncadd [#allocation5], 4294967280 }
   0xe   :  { %25 = sfence }
   0xf   :  { %s1928_s23 = smov 0   ;;  %s1930_s24 = smov 0  }
  0x10   :  { %s1932_s25 = smov 0  }
  0x11 LB: > { %s43_s0 = sadd.s32 1, %s1829_s24  ;;  %p1549_p5 = scmp.ge.s32.totalorder %s1833_s25, 1  ;;  %s1833_s25 = sphi %s1932_s25, %s31_s25   ;;  %s1829_s24 = sphi %s1930_s24, %s2156_s24   ;;  %s1825_s23 = sphi %s1928_s23, %s2155_s23  }
  0x12   : > { %p45_p6 = scmp.ge.s32.totalorder %s43_s0, 2  ;;  %p446_p7 = scmp.lt.s32.totalorder %s1833_s25, 3 }
  0x14   : > { %s2158_s0 = smov (%p45_p6, %s43_s0), 0  ;;  %p447_p8 = pnand %p1549_p5, %p446_p7 }
  0x15   : > { %v1761_v0 = vld [vmem:[%s2143_s4] sm:$0xff] (!%p447_p8)   ;;  %v1836_v1 = vmov (!%p447_p8), 0.0   ;;  %v1762_v2 = vld [vmem:[%s2143_s4 + $0x8] sm:$0xff] (!%p447_p8)   ;;  %vm1837_vm0 = vmmov (!%p447_p8), 0   ;;  %p500_p9 = scmp.lt.s32.totalorder (!%p447_p8), %s1825_s23, 1  ;;  %vm541_vm1 = vcmask (!%p447_p8), 261120   ;;  %v711_v39 = vlaneseq (!%p447_p8) }
  0x16   : > { %450 = sbr.rel (%p447_p8) target bundleno = 2256 (0x8d0), region = 76  ;;  %1627 = vmatprep.subr.bf16.mxu0 (!%p447_p8), %v1836_v1  ;;  %1635 = vmatprep.subr.bf16.mxu1 (!%p447_p8), %v1836_v1  ;;  %v1765_v3 = vld [vmem:[%s2144_s5] sm:$0xff] (!%p447_p8)   ;;  %v1764_v6 = vld [vmem:[%s2142_s3 + $0x8] sm:$0xff] (!%p447_p8)   ;;  %vm586_vm2 = vcmask (!%p447_p8), 257024   ;;  %vm716_vm3 = vcmask (!%p447_p8), 64512   ;;  %s1838_s20 = smov (!%p447_p8), 112  }
  0x17   : > { %1628 = vmatpush3.bf16.msra.mxu0 (!%p447_p8), %v1761_v0  ;;  %1631 = vmatprep.mubr.msk.bf16.mxu0 (!%p447_p8), %vm1837_vm0, %v1836_v1  ;;  %v1763_v4 = vld [vmem:[%s2142_s3] sm:$0xff] (!%p447_p8)   ;;  %v1766_v8 = vld [vmem:[%s2144_s5 + $0x8] sm:$0xff] (!%p447_p8)   ;;  %s1839_s21 = smov (!%p447_p8), 120   ;;  %s1840_s22 = smov (!%p447_p8), 104   ;;  %vm778_vm4 = vcmask (!%p447_p8), 1043456   ;;  %v712_v40 = vand.u32 (!%p447_p8), 127, %v711_v39 }
  0x18   : > { %1629 = vmatprep.subr.bf16.mxu0 (!%p447_p8), %v1836_v1  ;;  %1639 = vmatprep.mubr.msk.bf16.mxu1 (!%p447_p8), %vm1837_vm0, %v1836_v1  ;;  %v1841_v42 = vmov (!%p447_p8), -1000000.0   ;;  %s1844_s17 = smov (!%p447_p8), 24   ;;  %vm944_vm6 = vcmask (!%p447_p8), 130112   ;;  %vm1060_vm7 = vcmask (!%p447_p8), 195712   ;;  %vm1176_vm8 = vcmask (!%p447_p8), 261312  }
  0x19   : > { %1636 = vmatpush3.bf16.msra.mxu1 (!%p447_p8), %v1765_v3  ;;  %vm1380_vm9 = vcmask (!%p447_p8), 523264  }
  0x1a   : > { %1637 = vmatprep.subr.bf16.mxu1 (!%p447_p8), %v1836_v1 }
  0x1b   : > { %1630 = vmatpush3.bf16.msra.mxu0 (!%p447_p8), %v1762_v2 }
  0x1c   : > { %1643 = vmatprep.subr.bf16.mxu0 (!%p447_p8), %v1836_v1 }
  0x1d   : > { %s501_s30 = scalar_select %p500_p9, %s1825_s23, 1  ;;  %1638 = vmatpush3.bf16.msra.mxu1 %v1766_v8 }
  0x1e   : > { %1651 = vmatprep.subr.bf16.mxu1 %v1836_v1 }
  0x1f   : > { %s1966_s18 = sshll.u32 %s501_s30, 2 }
  0x20   : > { %s510_s26 = scalar_lea.vmem %s2141_s2, %s1966_s18  ;;  %s506_s16 = scalar_lea.vmem %s2140_s1, %s1966_s18 }
  0x21   : > { %v524_v5 = vld [vmem:[%s510_s26] sm:$0xf]  ;;  %s710_s26 = sld [smem:[#allocation6 + %s1825_s23]]  ;;  %s1842_s23 = smov 8  }
  0x22   : > { %1632 = vmatmul.mubr.msk.bf16.vlgmr.msra.gmra.mrb[0].mxu0 %vm541_vm1, %v524_v5  ;;  %v1988_v7 = vld [vmem:[%s506_s16] sm:$0xf]  ;;  %1640 = vmatmul.mubr.msk.bf16.vlgmr.msra.gmra.mrb[0].mxu1 %vm541_vm1, %v524_v5  ;;  %s1843_s16 = smov 16  }
  0x23   : > { %1644 = vmatpush3.bf16.msra.mxu0 %v1763_v4  ;;  %1647 = vmatprep.mubr.msk.bf16.mxu0 %vm1837_vm0, %v1836_v1 }
  0x24   : > { %1645 = vmatprep.subr.bf16.mxu0 %v1836_v1  ;;  %1653 = vmatprep.mubr.msk.bf16.mxu1 %vm1837_vm0, %v1836_v1 }
  0x27   : > { %1646 = vmatpush3.bf16.msra.mxu0 %v1764_v6  ;;  %v713_v41 = vstv %s710_s26 }
  0x28   : > { %1657 = vmatprep.subr.bf16.mxu0 %v1836_v1  ;;  %vm714_vm5 = vcmp.lt.s32.totalorder %v712_v40, %v713_v41 }
  0x29   : > { %v715_v43 = vsel %vm714_vm5, 0.0, %v1841_v42 }
  0x2a   : > { %1648 = vmatmul.mubr.msk.bf16.vlgmr.msra.gmra.mrb[4].mxu0 %vm541_vm1, %v1988_v7 }
  0x2b   : > { %1659 = vmatprep.mubr.msk.bf16.mxu0 %vm1837_vm0, %v1836_v1 }
  0xf5   : > { %v579_v9 = vpop.f32.mrb[0].mxu0  ;;  %v638_v23 = vpop.f32.mrb[0].mxu1 }
  0xf6   : > { %v585_v10 = vpack.c.bf16 %v579_v9, %v579_v9  ;;  %v1633_v11 = vpop.f32.mrb[1].mxu0  ;;  %v644_v24 = vpack.c.bf16 %v638_v23, %v638_v23  ;;  %v1641_v25 = vpop.f32.mrb[1].mxu1 }
  0xf7   : > { %v582_v12 = vpop.f32.mrb[2].mxu0  ;;  %v641_v26 = vpop.f32.mrb[2].mxu1 }
  0xf8   : > { %587 = vst.msk [vmem:[#allocation2] sm:$0xf] %vm586_vm2, %v585_v10  ;;  %v1634_v13 = vpop.f32.mrb[3].mxu0  ;;  %645 = vst.msk [vmem:[#allocation3] sm:$0xf] %vm586_vm2, %v644_v24  ;;  %v1642_v27 = vpop.f32.mrb[3].mxu1 }
  0xfd   : > { %v700_v14 = vpop.f32.mrb[4].mxu0 }
  0xfe   : > { %v706_v15 = vmul.f32 0.35355338, %v700_v14  ;;  %v1649_v16 = vpop.f32.mrb[5].mxu0 }
  0xff   : > { %v708_v17 = vld [vmem:[#allocation2] sm:$0xf]  ;;  %v703_v18 = vpop.f32.mrb[6].mxu0  ;;  %v2015_v28 = vld [vmem:[#allocation3] sm:$0xf] }
 0x100   : > { %v721_v19 = vsel %vm716_vm3, %v708_v17, 0  ;;  %v1564_v20 = vcombine.low %v708_v17, %v708_v17  ;;  %v1650_v21 = vpop.f32.mrb[7].mxu0  ;;  %v707_v22 = vpack.c.bf16 %v706_v15, %v706_v15  ;;  %v780_v29 = vsel %vm778_vm4, %v2015_v28, 0 }
 0x101   : > { %1652 = vmatpush3.bf16.xpose.msra.mxu1 %v721_v19  ;;  %1658 = vmatpush3.bf16.msra.mxu0 %v780_v29  ;;  %v1566_v11 = vcombine.low %v2015_v28, %v2015_v28 }
 0x102   : > { %948 = vrot.lane.b32.xlu1 %v1564_v20, %s1838_s20  ;;  %829 = vrot.lane.b32.xlu0 %v1564_v20, %s1839_s21 }
 0x103   : > { %1663 = vmatprep.subr.bf16.mxu1 %v1836_v1  ;;  %1669 = vmatprep.subr.bf16.mxu0 %v1836_v1 }
 0x106   : > { %946 = vrot.lane.b32.xlu1 %v707_v22, %s1838_s20  ;;  %824 = vrot.lane.b32.xlu0 %v707_v22, %s1839_s21 }
 0x108   : > { %1654 = vmatmul.mubr.msk.bf16.vlgmr.msra.gmra.mrb[4].mxu1 %vm716_vm3, %v707_v22 }
 0x109   : > { %1665 = vmatprep.mubr.msk.bf16.mxu1 %vm1837_vm0, %v1836_v1 }
 0x10a   : > { %1062 = vrot.lane.b32.xlu1 %v707_v22, %s1840_s22  ;;  %1064 = vrot.lane.b32.xlu0 %v1564_v20, %s1840_s22 }
 0x174   : > { %v830_v30 = vpop.permute.xlu0 %829  ;;  %v949_v32 = vpop.permute.xlu1 %948 }
 0x175   : > { %v835_v31 = vsel %vm716_vm3, %v830_v30, 0  ;;  %v954_v34 = vsel %vm716_vm3, %v949_v32, 0 }
 0x176   : > { %1664 = vmatpush3.bf16.xpose.msra.mxu1 %v835_v31 }
 0x177   : > { %1675 = vmatprep.subr.bf16.mxu1 %v1836_v1 }
 0x178   : > { %v825_v33 = vpop.permute.xlu0 %824  ;;  %v947_v36 = vpop.permute.xlu1 %946 }
 0x17c   : > { %v1065_v35 = vpop.permute.xlu0 %1064  ;;  %v1063_v38 = vpop.permute.xlu1 %1062 }
 0x17d   : > { %1666 = vmatmul.mubr.msk.bf16.vlgmr.msra.gmra.mrb[8].mxu1 %vm716_vm3, %v825_v33  ;;  %v1070_v37 = vsel %vm716_vm3, %v1065_v35, 0 }
 0x17e   : > { %1676 = vmatpush3.bf16.xpose.msra.mxu1 %v954_v34  ;;  %1677 = vmatprep.mubr.msk.bf16.mxu1 %vm1837_vm0, %v1836_v1 }
 0x17f   : > { %1687 = vmatprep.subr.bf16.mxu1 %v1836_v1 }
 0x185   : > { %1678 = vmatmul.mubr.msk.bf16.vlgmr.msra.gmra.mrb[12].mxu1 %vm716_vm3, %v947_v36 }
 0x186   : > { %1688 = vmatpush3.bf16.xpose.msra.mxu1 %v1070_v37  ;;  %1689 = vmatprep.mubr.msk.bf16.mxu1 %vm1837_vm0, %v1836_v1 }
 0x187   : > { %1699 = vmatprep.subr.bf16.mxu1 %v1836_v1 }
 0x18d   : > { %1690 = vmatmul.mubr.msk.bf16.vlgmr.msra.gmra.mrb[16].mxu1 %vm716_vm3, %v1063_v38 }
 0x18e   : > { %1703 = vmatprep.mubr.msk.bf16.mxu1 %vm1837_vm0, %v1836_v1 }
 0x1db   : > { %v757_v44 = vpop.f32.mrb[4].mxu1 }
 0x1dc   : > { %v758_v45 = vadd.f32 %v757_v44, %v715_v43  ;;  %v1655_v46 = vpop.f32.mrb[5].mxu1 }
 0x1dd   : > { %v760_v47 = vpop.f32.mrb[6].mxu1 }
 0x1de   : > { %v1656_v48 = vpop.f32.mrb[7].mxu1  ;;  %v763_v49 = vsel %vm716_vm3, %v758_v45, -inf }
 0x1df   : > { %764 = vmax.xlane.f32.xlu0 %v763_v49 }
 0x250   : > { %v871_v50 = vpop.f32.mrb[8].mxu1 }
 0x251   : > { %v872_v51 = vadd.f32 %v871_v50, %v715_v43  ;;  %v1667_v52 = vpop.f32.mrb[9].mxu1 }
 0x252   : > { %v874_v53 = vpop.f32.mrb[10].mxu1 }
 0x253   : > { %v1668_v54 = vpop.f32.mrb[11].mxu1  ;;  %v877_v55 = vsel %vm716_vm3, %v872_v51, -inf }
 0x254   : > { %878 = vmax.xlane.f32.xlu1 %v877_v55 }
 0x258   : > { %v990_v56 = vpop.f32.mrb[12].mxu1 }
 0x259   : > { %v991_v57 = vadd.f32 %v990_v56, %v715_v43  ;;  %v1679_v58 = vpop.f32.mrb[13].mxu1 }
 0x25a   : > { %v993_v59 = vpop.f32.mrb[14].mxu1  ;;  %v1770_v58 = vld [vmem:[%s2145_s6 + $0x8] sm:$0xff]  }
 0x25b   : > { %v1680_v60 = vpop.f32.mrb[15].mxu1  ;;  %v996_v61 = vsel %vm716_vm3, %v991_v57, -inf }
 0x25c   : > { %997 = vmax.xlane.f32.xlu0 %v996_v61 }
 0x260   : > { %v1106_v62 = vpop.f32.mrb[16].mxu1 }
 0x261   : > { %v1107_v63 = vadd.f32 %v1106_v62, %v715_v43  ;;  %v1691_v0 = vpop.f32.mrb[17].mxu1 }
 0x262   : > { %v1109_v2 = vpop.f32.mrb[18].mxu1 }
 0x263   : > { %v1692_v3 = vpop.f32.mrb[19].mxu1  ;;  %v1112_v4 = vsel %vm716_vm3, %v1107_v63, -inf }
 0x264   : > { %1113 = vmax.xlane.f32.xlu0 %v1112_v4 }
 0x26c   : > { %v765_v5 = vpop.xlane.xlu0 %764 }
 0x26d   : > { %v766_v6 = vsub.f32 %v758_v45, %v765_v5 }
 0x26f   : > { %v767_v8 = vmul.f32 1.442695, %v766_v6 }
 0x271   : > { %1777 = vpow2.f32 %v767_v8 }
 0x27b   : > { %v1778_v9 = vpop.eup %1777 }
 0x27c   : > { %v769_v10 = vsel %vm716_vm3, %v1778_v9, 0.0 }
 0x27d   : > { %770 = vadd.xlane.f32.xlu1 %v769_v10  ;;  %v1239_v10 = vunpack.c.l.bf16 %v1988_v7  ;;  %v1772_v7 = vld [vmem:[%s2148_s9 + $0x8] sm:$0xff]  }
 0x28e   : > { %892 = vrot.lane.b32.xlu1 %v1566_v11, %s1839_s21  ;;  %s517_s21 = scalar_lea.vmem %s2154_s15, %s1966_s18 }
 0x2e1   : > { %v879_v12 = vpop.xlane.xlu1 %878 }
 0x2e2   : > { %v880_v13 = vsub.f32 %v872_v51, %v879_v12 }
 0x2e4   : > { %v881_v14 = vmul.f32 1.442695, %v880_v13 }
 0x2e6   : > { %1779 = vpow2.f32 %v881_v14 }
 0x2e9   : > { %v998_v15 = vpop.xlane.xlu0 %997 }
 0x2ea   : > { %v999_v16 = vsub.f32 %v991_v57, %v998_v15  ;;  %v1769_v57 = vld [vmem:[%s2145_s6] sm:$0xff]  }
 0x2eb   : > { %1700 = vmatpush3.bf16.msra.mxu1 %v1769_v57 }
 0x2ec   : > { %v1000_v17 = vmul.f32 1.442695, %v999_v16  ;;  %1701 = vmatprep.subr.bf16.mxu1 %v1836_v1 }
 0x2ee   : > { %1781 = vpow2.f32 %v1000_v17 }
 0x2ef   : > { %1702 = vmatpush3.bf16.msra.mxu1 %v1770_v58 }
 0x2f0   : > { %v1780_v18 = vpop.eup %1779  ;;  %1715 = vmatprep.subr.bf16.mxu1 %v1836_v1 }
 0x2f1   : > { %v1114_v19 = vpop.xlane.xlu0 %1113  ;;  %v883_v20 = vsel %vm716_vm3, %v1780_v18, 0.0 }
 0x2f2   : > { %v1115_v21 = vsub.f32 %v1107_v63, %v1114_v19  ;;  %884 = vadd.xlane.f32.xlu0 %v883_v20  ;;  %v1771_v19 = vld [vmem:[%s2148_s9] sm:$0xff]  }
 0x2f3   : > { %v1773_v20 = vld [vmem:[%s2150_s11] sm:$0xff]  }
 0x2f4   : > { %v1116_v22 = vmul.f32 1.442695, %v1115_v21  ;;  %v1774_v21 = vld [vmem:[%s2150_s11 + $0x8] sm:$0xff]  }
 0x2f6   : > { %1783 = vpow2.f32 %v1116_v22 }
 0x2f8   : > { %v1782_v23 = vpop.eup %1781 }
 0x2f9   : > { %v1002_v24 = vsel %vm716_vm3, %v1782_v23, 0.0 }
 0x2fa   : > { %1003 = vadd.xlane.f32.xlu1 %v1002_v24 }
 0x300   : > { %v1784_v25 = vpop.eup %1783 }
 0x301   : > { %v1118_v26 = vsel %vm716_vm3, %v1784_v25, 0.0 }
 0x302   : > { %1119 = vadd.xlane.f32.xlu0 %v1118_v26 }
 0x30a   : > { %v771_v27 = vpop.xlane.xlu1 %770 }
 0x30b   : > { %1785 = vrcp.f32 %v771_v27  ;;  %1124 = vrot.lane.b32.xlu1 %v1566_v11, %s1840_s22 }
 0x30e   : > { %v893_v30 = vpop.permute.xlu1 %892 }
 0x30f   : > { %v898_v32 = vsel %vm778_vm4, %v893_v30, 0 }
 0x315   : > { %v1786_v28 = vpop.eup %1785 }
 0x316   : > { %v773_v29 = vmul.f32 %v1786_v28, %v1778_v9 }
 0x318   : > { %1008 = vrot.lane.b32.xlu0 %v1566_v11, %s1838_s20  ;;  %v774_v31 = vpack.c.bf16 %v773_v29, %v773_v29 }
 0x31a   : > { %1660 = vmatmul.mubr.msk.bf16.vlgmr.msra.gmra.mrb[8].mxu0 %vm716_vm3, %v774_v31  ;;  %v1575_v31 = vld [vmem:[%s2146_s7] ss:$0 sm:$0xff] }
 0x31b   : > { %1670 = vmatpush3.bf16.msra.mxu0 %v898_v32  ;;  %1671 = vmatprep.mubr.msk.bf16.mxu0 %vm1837_vm0, %v1836_v1 }
 0x31c   : > { %1681 = vmatprep.subr.bf16.mxu0 %v1836_v1 }
 0x37f   : > { %v885_v33 = vpop.xlane.xlu0 %884 }
 0x380   : > { %1787 = vrcp.f32 %v885_v33  ;;  %v1576_v33 = vld [vmem:[%s2147_s8] ss:$0 sm:$0xff] }
 0x387   : > { %v1004_v34 = vpop.xlane.xlu1 %1003 }
 0x388   : > { %1789 = vrcp.f32 %v1004_v34 }
 0x38a   : > { %v1788_v35 = vpop.eup %1787 }
 0x38b   : > { %v887_v36 = vmul.f32 %v1788_v35, %v1780_v18  ;;  %v1125_v43 = vpop.permute.xlu1 %1124 }
 0x38c   : > { %v1130_v45 = vsel %vm778_vm4, %v1125_v43, 0 }
 0x38d   : > { %v888_v37 = vpack.c.bf16 %v887_v36, %v887_v36 }
 0x38f   : > { %1672 = vmatmul.mubr.msk.bf16.vlgmr.msra.gmra.mrb[12].mxu0 %vm716_vm3, %v888_v37  ;;  %v1120_v38 = vpop.xlane.xlu0 %1119  ;;  %v1775_v37 = vld [vmem:[%s2150_s11 + $0x10] sm:$0xff]  }
 0x390   : > { %1791 = vrcp.f32 %v1120_v38  ;;  %1683 = vmatprep.mubr.msk.bf16.mxu0 %vm1837_vm0, %v1836_v1  ;;  %v1776_v38 = vld [vmem:[%s2150_s11 + $0x18] sm:$0xff]  }
 0x392   : > { %v1790_v39 = vpop.eup %1789 }
 0x393   : > { %v1006_v40 = vmul.f32 %v1790_v39, %v1782_v23  ;;  %v1009_v41 = vpop.permute.xlu0 %1008  ;;  %v1577_v39 = vld [vmem:[%s2149_s10] ss:$0 sm:$0xff] }
 0x394   : > { %v1014_v42 = vsel %vm778_vm4, %v1009_v41, 0 }
 0x395   : > { %1682 = vmatpush3.bf16.msra.mxu0 %v1014_v42  ;;  %v1007_v44 = vpack.c.bf16 %v1006_v40, %v1006_v40 }
 0x396   : > { %1693 = vmatprep.subr.bf16.mxu0 %v1836_v1 }
 0x398   : > { %1684 = vmatmul.mubr.msk.bf16.vlgmr.msra.gmra.mrb[16].mxu0 %vm716_vm3, %v1007_v44 }
 0x399   : > { %1694 = vmatpush3.bf16.msra.mxu0 %v1130_v45  ;;  %1695 = vmatprep.mubr.msk.bf16.mxu0 %vm1837_vm0, %v1836_v1 }
 0x39a   : > { %v1792_v46 = vpop.eup %1791  ;;  %1707 = vmatprep.subr.bf16.mxu0 %v1836_v1 }
 0x39b   : > { %v1122_v47 = vmul.f32 %v1792_v46, %v1784_v25 }
 0x39d   : > { %v1123_v48 = vpack.c.bf16 %v1122_v47, %v1122_v47 }
 0x3a0   : > { %1696 = vmatmul.mubr.msk.bf16.vlgmr.msra.gmra.mrb[20].mxu0 %vm716_vm3, %v1123_v48 }
 0x3a1   : > { %1711 = vmatprep.mubr.msk.bf16.mxu0 %vm1837_vm0, %v1836_v1  ;;  %1708 = vmatpush3.bf16.msra.mxu0 %v1771_v19 }
 0x3a2   : > { %1709 = vmatprep.subr.bf16.mxu0 %v1836_v1 }
 0x3a5   : > { %1710 = vmatpush3.bf16.msra.mxu0 %v1772_v7 }
 0x3ed   : > { %v816_v49 = vpop.f32.mrb[8].mxu0 }
 0x3ee   : > { %822 = vst.msk [vmem:[#allocation4] sm:$0xff] %vm716_vm3, %v816_v49  ;;  %v1661_v50 = vpop.f32.mrb[9].mxu0 }
 0x3ef   : > { %v819_v51 = vpop.f32.mrb[10].mxu0 }
 0x3f0   : > { %v1662_v52 = vpop.f32.mrb[11].mxu0 }
 0x462   : > { %v934_v53 = vpop.f32.mrb[12].mxu0 }
 0x463   : > { %941 = vrot.lane.b32.xlu1 %v934_v53, %s1842_s23  ;;  %v1673_v54 = vpop.f32.mrb[13].mxu0 }
 0x464   : > { %v937_v55 = vpop.f32.mrb[14].mxu0 }
 0x465   : > { %v1674_v56 = vpop.f32.mrb[15].mxu0 }
 0x46b   : > { %v1050_v59 = vpop.f32.mrb[16].mxu0 }
 0x46c   : > { %1057 = vrot.lane.b32.xlu0 %v1050_v59, %s1843_s16  ;;  %v1685_v60 = vpop.f32.mrb[17].mxu0 }
 0x46d   : > { %v1053_v61 = vpop.f32.mrb[18].mxu0 }
 0x46e   : > { %v1686_v62 = vpop.f32.mrb[19].mxu0 }
 0x473   : > { %v1166_v63 = vpop.f32.mrb[20].mxu0 }
 0x474   : > { %1173 = vrot.lane.b32.xlu1 %v1166_v63, %s1844_s17  ;;  %v1697_v0 = vpop.f32.mrb[21].mxu0 }
 0x475   : > { %v1169_v2 = vpop.f32.mrb[22].mxu0 }
 0x476   : > { %v1698_v3 = vpop.f32.mrb[23].mxu0  ;;  %v1587_v2 = vld [vmem:[%s2152_s13] ss:$0 sm:$0xff] }
 0x4d5   : > { %v942_v4 = vpop.permute.xlu1 %941 }
 0x4d6   : > { %945 = vst.msk [vmem:[#allocation4] sm:$0xff] %vm944_vm6, %v942_v4  ;;  %v1588_v4 = vld [vmem:[%s2153_s14] ss:$0 sm:$0xff] }
 0x4de   : > { %v1058_v5 = vpop.permute.xlu0 %1057 }
 0x4df   : > { %1061 = vst.msk [vmem:[#allocation4] sm:$0xff] %vm1060_vm7, %v1058_v5 }
 0x4e6   : > { %v1174_v6 = vpop.permute.xlu1 %1173 }
 0x4e7   : > { %1177 = vst.msk [vmem:[#allocation4] sm:$0xff] %vm1176_vm8, %v1174_v6 }
 0x4ee   : > { %v1178_v8 = vld [vmem:[#allocation4] sm:$0xff] }
 0x4ef   : > { %v1179_v9 = vpack.c.bf16 %v1178_v8, %v1178_v8 }
 0x4f1   : > { %1704 = vmatmul.mubr.msk.bf16.vlgmr.msra.gmra.mrb[20].mxu1 %vm541_vm1, %v1179_v9 }
 0x4f2   : > { %1723 = vmatprep.mubr.msk.bf16.mxu1 %vm1837_vm0, %v1836_v1  ;;  %1716 = vmatpush3.bf16.msra.mxu1 %v1773_v20 }
 0x4f3   : > { %1717 = vmatprep.subr.bf16.mxu1 %v1836_v1 }
 0x4f6   : > { %1718 = vmatpush3.bf16.msra.mxu1 %v1774_v21 }
 0x4f7   : > { %1719 = vmatprep.subr.bf16.mxu1 %v1836_v1 }
 0x4fa   : > { %1720 = vmatpush3.bf16.msra.mxu1 %v1775_v37 }
 0x4fb   : > { %1721 = vmatprep.subr.bf16.mxu1 %v1836_v1  ;;  %v1581_v1 = vld [vmem:[%s2151_s12] ss:$0 sm:$0xff] }
 0x4fe   : > { %1722 = vmatpush3.bf16.msra.mxu1 %v1776_v38 }
 0x5c4   : > { %v1233_v11 = vpop.f32.mrb[20].mxu1 }
 0x5c5   : > { %v1240_v12 = vadd.f32 %v1239_v10, %v1233_v11  ;;  %v1705_v13 = vpop.f32.mrb[21].mxu1 }
 0x5c6   : > { %v1236_v14 = vpop.f32.mrb[22].mxu1 }
 0x5c7   : > { %v1706_v15 = vpop.f32.mrb[23].mxu1  ;;  %v1243_v16 = vsel %vm541_vm1, %v1240_v12, 0.0  ;;  %v1246_v17 = vmul.f32 %v1240_v12, %v1240_v12 }
 0x5c8   : > { %1244 = vadd.xlane.f32.xlu0 %v1243_v16 }
 0x5c9   : > { %v1247_v18 = vsel %vm541_vm1, %v1246_v17, 0.0 }
 0x5ca   : > { %1248 = vadd.xlane.f32.xlu1 %v1247_v18 }
 0x655   : > { %v1245_v22 = vpop.xlane.xlu0 %1244 }
 0x656   : > { %v1250_v23 = vmul.f32 0.03125, %v1245_v22 }
 0x657   : > { %v1249_v24 = vpop.xlane.xlu1 %1248 }
 0x658   : > { %v1252_v25 = vmul.f32 %v1250_v23, %v1250_v23  ;;  %v1251_v26 = vmul.f32 0.03125, %v1249_v24  ;;  %v1254_v29 = vsub.f32 %v1240_v12, %v1250_v23 }
 0x65a   : > { %v1253_v27 = vsub.f32 %v1251_v26, %v1252_v25 }
 0x65c   : > { %v1255_v28 = vadd.f32 1e-05, %v1253_v27 }
 0x65e   : > { %1793 = vrsqrt.f32 %v1255_v28 }
 0x668   : > { %v1794_v30 = vpop.eup %1793 }
 0x669   : > { %v1257_v32 = vmul.f32 %v1794_v30, %v1254_v29 }
 0x66b   : > { %v1264_v34 = vmul.f32 %v1575_v31, %v1257_v32 }
 0x66d   : > { %v1271_v35 = vadd.f32 %v1576_v33, %v1264_v34 }
 0x66f   : > { %v1272_v36 = vpack.c.bf16 %v1271_v35, %v1271_v35 }
 0x671   : > { %1712 = vmatmul.mubr.msk.bf16.vlgmr.msra.gmra.mrb[24].mxu0 %vm541_vm1, %v1272_v36 }
 0x744   : > { %v1333_v40 = vpop.f32.mrb[24].mxu0 }
 0x745   : > { %v1334_v41 = vadd.f32 %v1577_v39, %v1333_v40  ;;  %v1713_v42 = vpop.f32.mrb[25].mxu0 }
 0x746   : > { %v1336_v43 = vpop.f32.mrb[26].mxu0 }
 0x747   : > { %v1339_v44 = vmax.f32 %v1334_v41, 0.0  ;;  %v1714_v45 = vpop.f32.mrb[27].mxu0 }
 0x749   : > { %v1340_v46 = vpack.c.bf16 %v1339_v44, %v1339_v44 }
 0x74b   : > { %1724 = vmatmul.mubr.msk.bf16.vlgmr.msra.gmra.mrb[24].mxu1 %vm1380_vm9, %v1340_v46 }
 0x81e   : > { %v1418_v47 = vpop.f32.mrb[24].mxu1 }
 0x81f   : > { %v1419_v48 = vadd.f32 %v1581_v1, %v1418_v47  ;;  %v1725_v49 = vpop.f32.mrb[25].mxu1 }
 0x820   : > { %v1421_v50 = vpop.f32.mrb[26].mxu1 }
 0x821   : > { %v1424_v51 = vadd.f32 %v1419_v48, %v1271_v35  ;;  %v1726_v52 = vpop.f32.mrb[27].mxu1 }
 0x823   : > { %v1427_v53 = vsel %vm541_vm1, %v1424_v51, 0.0  ;;  %v1430_v54 = vmul.f32 %v1424_v51, %v1424_v51 }
 0x824   : > { %1428 = vadd.xlane.f32.xlu0 %v1427_v53 }
 0x825   : > { %v1431_v55 = vsel %vm541_vm1, %v1430_v54, 0.0 }
 0x828   : > { %1432 = vadd.xlane.f32.xlu0 %v1431_v55 }
 0x8b1   : > { %v1429_v56 = vpop.xlane.xlu0 %1428 }
 0x8b2   : > { %v1434_v57 = vmul.f32 0.03125, %v1429_v56 }
 0x8b4   : > { %v1436_v59 = vmul.f32 %v1434_v57, %v1434_v57  ;;  %v1438_v63 = vsub.f32 %v1424_v51, %v1434_v57 }
 0x8b5   : > { %v1433_v58 = vpop.xlane.xlu0 %1432 }
 0x8b6   : > { %v1435_v60 = vmul.f32 0.03125, %v1433_v58 }
 0x8b8   : > { %v1437_v61 = vsub.f32 %v1435_v60, %v1436_v59 }
 0x8ba   : > { %v1439_v62 = vadd.f32 1e-05, %v1437_v61 }
 0x8bc   : > { %1795 = vrsqrt.f32 %v1439_v62 }
 0x8c6   : > { %v1796_v0 = vpop.eup %1795 }
 0x8c7   : > { %v1441_v3 = vmul.f32 %v1796_v0, %v1438_v63 }
 0x8c9   : > { %v1448_v5 = vmul.f32 %v1587_v2, %v1441_v3 }
 0x8cb   : > { %v1455_v6 = vadd.f32 %v1588_v4, %v1448_v5 }
 0x8cd   : > { %v1456_v8 = vpack.c.bf16 %v1455_v6, %v1455_v6 }
 0x8cf   : > { %1458 = vst.msk [vmem:[%s517_s21] sm:$0xf] %vm586_vm2, %v1456_v8 }
 0x8d0 PF: > { %s31_s25 = sadd.s32 1, %s1833_s25   ;;  %s2155_s23 = smov %s1829_s24 }
 0x8d1   : > { %p28_p10 = scmp.ge.s32.totalorder %s31_s25, 4   ;;  %s2156_s24 = smov %s2158_s0 }
 0x8d3   :  { %30 = sbr.rel (!%p28_p10) target bundleno = 17 (0x11), region = 113 }

</bundles_post_ra>
